<compile_context>
chip_gen: v7x
topology: tpu7x:2x2x1
jax: 0.10.0
libtpu: 0.0.40
codegen_flags: <defaults>
</compile_context>

<pallas_src>
import jax
import jax.numpy as jnp
from jax import lax
from jax.experimental import pallas as pl
from jax.experimental.pallas import tpu as pltpu

# ---------------- configuration (small, ALBERT-like but synthetic) ----------
EMBED_DIM = 128          # stands in for albert-base 768
VOCAB     = 100
VOCAB_PAD = 128          # pad vocab rows so the one-hot matmul K dim is 128
SEQ       = 8
BATCH     = 2
GROUP_PAD = 8            # sublane-aligned rows per input group
N_GROUPS  = 5            # function_tokens, function_name, api_seq, doc, neg_doc


# ---------------- fused Pallas kernel ----------------------------------------
def _fused_mmscs_kernel(ids_ref, emb_ref, pw_ref, pb_ref, fw_ref, fb_ref,
                        out_ref):
    """Embedding lookup + mean pool + tanh pooler + FC + two cosine sims."""
    R, S = ids_ref.shape              # (N_GROUPS*GROUP_PAD, SEQ)
    V, D = emb_ref.shape              # (VOCAB_PAD, EMBED_DIM)
    GP = GROUP_PAD

    ids = ids_ref[...]                                    # (R, S) int32
    lane_v = lax.broadcasted_iota(jnp.int32, (R, V), 1)   # vocab index per lane

    # One-hot token counts (mean pooling folded in as 1/S); S is tiny & static
    # so the loop fully unrolls into S compare+add passes over (R, V) vregs.
    counts = jnp.zeros((R, V), jnp.float32)
    for s in range(S):
        counts = counts + (ids[:, s:s + 1] == lane_v).astype(jnp.float32)
    counts = counts * jnp.float32(1.0 / S)

    # Mean token embedding via the MXU: (R, V) @ (V, D)
    mean_emb = jnp.dot(counts, emb_ref[...],
                       preferred_element_type=jnp.float32)

    # ALBERT-style pooler: tanh(x @ W + b)
    pooled = jnp.tanh(
        jnp.dot(mean_emb, pw_ref[...], preferred_element_type=jnp.float32)
        + pb_ref[...])

    # Tile-aligned group slices (each group owns one 8-sublane tile).
    ft  = pooled[0 * GP:1 * GP]
    fn  = pooled[1 * GP:2 * GP]
    api = pooled[2 * GP:3 * GP]
    doc = pooled[3 * GP:4 * GP]
    neg = pooled[4 * GP:5 * GP]

    # fc(cat([ft, fn, api], dim=1)) == ft @ W0 + fn @ W1 + api @ W2 + b
    c = (jnp.dot(ft,  fw_ref[0], preferred_element_type=jnp.float32)
         + jnp.dot(fn,  fw_ref[1], preferred_element_type=jnp.float32)
         + jnp.dot(api, fw_ref[2], preferred_element_type=jnp.float32)
         + fb_ref[...])

    # cosine(x1, x2) = <x1,x2> / max(||x1||*||x2||, eps)   (torch, eps=1e-6)
    #               = <x1,x2> * rsqrt(max(||x1||^2 * ||x2||^2, eps^2))
    eps2 = jnp.float32(1e-6 * 1e-6)
    c2 = jnp.sum(c * c,     axis=-1, keepdims=True)
    d2 = jnp.sum(doc * doc, axis=-1, keepdims=True)
    n2 = jnp.sum(neg * neg, axis=-1, keepdims=True)
    pos_sim = jnp.sum(c * doc, axis=-1, keepdims=True) * \
        lax.rsqrt(jnp.maximum(c2 * d2, eps2))
    neg_sim = jnp.sum(c * neg, axis=-1, keepdims=True) * \
        lax.rsqrt(jnp.maximum(c2 * n2, eps2))

    # Lane-dense output slab: lane 0 = pos, lane 1 = neg, rest zero.
    lane = lax.broadcasted_iota(jnp.int32, (GP, D), 1)
    out_ref[...] = jnp.where(lane == 0, pos_sim,
                             jnp.where(lane == 1, neg_sim, 0.0))


def fused_mmscs(ids, emb, pooler_w, pooler_b, fc_w3, fc_b):
    R, S = ids.shape
    D = emb.shape[1]
    return pl.pallas_call(
        _fused_mmscs_kernel,
        out_shape=jax.ShapeDtypeStruct((GROUP_PAD, D), jnp.float32),
        grid=(1,),
        in_specs=[
            pl.BlockSpec((R, S),              lambda i: (0, 0)),
            pl.BlockSpec(emb.shape,           lambda i: (0, 0)),
            pl.BlockSpec(pooler_w.shape,      lambda i: (0, 0)),
            pl.BlockSpec(pooler_b.shape,      lambda i: (0, 0)),
            pl.BlockSpec(fc_w3.shape,         lambda i: (0, 0, 0)),
            pl.BlockSpec(fc_b.shape,          lambda i: (0, 0)),
        ],
        out_specs=pl.BlockSpec((GROUP_PAD, D), lambda i: (0, 0)),
        compiler_params=pltpu.CompilerParams(
            dimension_semantics=("arbitrary",)),
    )(ids, emb, pooler_w, pooler_b, fc_w3, fc_b)


# ---------------- parameter init (deterministic, synthetic) -----------------
def init_params(key, embedding_dim=EMBED_DIM, vocab=VOCAB):
    k_emb, k_pw, k_pb, k_fw, k_fb = jax.random.split(key, 5)
    scale = 0.02
    return {
        # synthetic ALBERT stand-in: token embedding table + tanh pooler dense
        "embed":    scale * jax.random.normal(k_emb, (vocab, embedding_dim), jnp.float32),
        "pooler_w": scale * jax.random.normal(k_pw, (embedding_dim, embedding_dim), jnp.float32),
        "pooler_b": scale * jax.random.normal(k_pb, (1, embedding_dim), jnp.float32),
        # self.fc = nn.Linear(embedding_dim * 3, embedding_dim)
        # stored as (3D, D) == transpose of PyTorch's (D, 3D) weight
        "fc_w":     scale * jax.random.normal(k_fw, (embedding_dim * 3, embedding_dim), jnp.float32),
        "fc_b":     scale * jax.random.normal(k_fb, (1, embedding_dim), jnp.float32),
    }


# ---------------- forward pass (mirrors MMSCSModel.forward) -----------------
def mmscs_forward(params, function_tokens, function_name, api_sequence,
                  docstring_tokens, negative_docstring_tokens):
    # TODO(synk): the pretrained ALBERT transformer (`AlbertModel.from_pretrained`)
    # has no in-script equivalent; a deterministic embedding-lookup -> mean-pool
    # -> tanh-pooler stand-in produces the pooled [1] output instead.
    B, S = function_tokens.shape
    inputs = (function_tokens, function_name, api_sequence,
              docstring_tokens, negative_docstring_tokens)

    # Pad each (B, S) id group to GROUP_PAD rows so every group is one
    # sublane tile; pad ids are 0 (valid row of the table -> finite garbage
    # in padded rows, which we never read back).
    def pad_rows(t):
        return jnp.pad(t.astype(jnp.int32), ((0, GROUP_PAD - B), (0, 0)))
    ids = jnp.concatenate([pad_rows(t) for t in inputs], axis=0)  # (5*GP, S)

    # Pad vocab rows to a full 128 lanes worth of one-hot columns.
    emb = jnp.pad(params["embed"], ((0, VOCAB_PAD - VOCAB), (0, 0)))
    fc_w3 = params["fc_w"].reshape(3, EMBED_DIM, EMBED_DIM)

    out = fused_mmscs(ids, emb, params["pooler_w"], params["pooler_b"],
                      fc_w3, params["fc_b"])
    return out[:B, 0], out[:B, 1]       # (B,), (B,)


# ---------------- demo -------------------------------------------------------
if __name__ == "__main__":
    key = jax.random.PRNGKey(0)
    params = init_params(key)

    k1, k2, k3, k4, k5 = jax.random.split(jax.random.PRNGKey(1), 5)
    function_tokens = jax.random.randint(k1, (BATCH, SEQ), 0, VOCAB, jnp.int32)
    function_name   = jax.random.randint(k2, (BATCH, SEQ), 0, VOCAB, jnp.int32)
    api_sequence    = jax.random.randint(k3, (BATCH, SEQ), 0, VOCAB, jnp.int32)
    docstring_toks  = jax.random.randint(k4, (BATCH, SEQ), 0, VOCAB, jnp.int32)
    neg_docstring   = jax.random.randint(k5, (BATCH, SEQ), 0, VOCAB, jnp.int32)

    pos_sim, neg_sim = jax.jit(mmscs_forward)(
        params, function_tokens, function_name, api_sequence,
        docstring_toks, neg_docstring)
    jax.block_until_ready((pos_sim, neg_sim))

    assert pos_sim.shape == (BATCH,) and neg_sim.shape == (BATCH,)
    assert bool(jnp.all(jnp.isfinite(pos_sim))) and bool(jnp.all(jnp.isfinite(neg_sim)))
    assert bool(jnp.all(jnp.abs(pos_sim) <= 1.0 + 1e-5))
    assert bool(jnp.all(jnp.abs(neg_sim) <= 1.0 + 1e-5))
    print("KERNEL_OK")
</pallas_src>

<mosaic_0001>
module attributes {stable_mosaic.version = 11 : i64} {
  func.func @_fused_mmscs_kernel(%arg0: i32, %arg1: memref<40x8xi32, #tpu.memory_space<vmem>>, %arg2: memref<128x128xf32, #tpu.memory_space<vmem>>, %arg3: memref<128x128xf32, #tpu.memory_space<vmem>>, %arg4: memref<1x128xf32, #tpu.memory_space<vmem>>, %arg5: memref<3x128x128xf32, #tpu.memory_space<vmem>>, %arg6: memref<1x128xf32, #tpu.memory_space<vmem>>, %arg7: memref<8x128xf32, #tpu.memory_space<vmem>>) attributes {dimension_semantics = [#tpu.dimension_semantics<arbitrary>], iteration_bounds = array<i64: 1>, scalar_prefetch = 0 : i64, scratch_operands = 0 : i64, tpu.core_type = #tpu.core_type<tc>, window_params = [{pipeline_mode = #tpu.pipeline_mode<synchronous>, transform_indices = @transform_0, window_bounds = array<i64: 40, 8>}, {pipeline_mode = #tpu.pipeline_mode<synchronous>, transform_indices = @transform_1, window_bounds = array<i64: 128, 128>}, {pipeline_mode = #tpu.pipeline_mode<synchronous>, transform_indices = @transform_2, window_bounds = array<i64: 128, 128>}, {pipeline_mode = #tpu.pipeline_mode<synchronous>, transform_indices = @transform_3, window_bounds = array<i64: 1, 128>}, {pipeline_mode = #tpu.pipeline_mode<synchronous>, transform_indices = @transform_4, window_bounds = array<i64: 3, 128, 128>}, {pipeline_mode = #tpu.pipeline_mode<synchronous>, transform_indices = @transform_5, window_bounds = array<i64: 1, 128>}, {pipeline_mode = #tpu.pipeline_mode<synchronous>, transform_indices = @transform_6, window_bounds = array<i64: 8, 128>}]} {
    %c0 = arith.constant 0 : index
    %c0_0 = arith.constant 0 : index
    %0 = vector.load %arg1[%c0, %c0_0] : memref<40x8xi32, #tpu.memory_space<vmem>>, vector<40x8xi32>
    %1 = tpu.iota {dimensions = array<i32: 1>} : vector<40x128xi32>
    %cst = arith.constant 0.000000e+00 : f32
    %2 = vector.broadcast %cst : f32 to vector<40x128xf32>
    %3 = vector.extract_strided_slice %0 {offsets = [0, 0], sizes = [40, 1], strides = [1, 1]} : vector<40x8xi32> to vector<40x1xi32>
    %4 = vector.broadcast %3 : vector<40x1xi32> to vector<40x128xi32>
    %5 = arith.cmpi eq, %4, %1 : vector<40x128xi32>
    %6 = arith.extui %5 : vector<40x128xi1> to vector<40x128xi32>
    %7 = arith.sitofp %6 : vector<40x128xi32> to vector<40x128xf32>
    %8 = arith.addf %2, %7 : vector<40x128xf32>
    %9 = vector.extract_strided_slice %0 {offsets = [0, 1], sizes = [40, 1], strides = [1, 1]} : vector<40x8xi32> to vector<40x1xi32>
    %10 = vector.broadcast %9 : vector<40x1xi32> to vector<40x128xi32>
    %11 = arith.cmpi eq, %10, %1 : vector<40x128xi32>
    %12 = arith.extui %11 : vector<40x128xi1> to vector<40x128xi32>
    %13 = arith.sitofp %12 : vector<40x128xi32> to vector<40x128xf32>
    %14 = arith.addf %8, %13 : vector<40x128xf32>
    %15 = vector.extract_strided_slice %0 {offsets = [0, 2], sizes = [40, 1], strides = [1, 1]} : vector<40x8xi32> to vector<40x1xi32>
    %16 = vector.broadcast %15 : vector<40x1xi32> to vector<40x128xi32>
    %17 = arith.cmpi eq, %16, %1 : vector<40x128xi32>
    %18 = arith.extui %17 : vector<40x128xi1> to vector<40x128xi32>
    %19 = arith.sitofp %18 : vector<40x128xi32> to vector<40x128xf32>
    %20 = arith.addf %14, %19 : vector<40x128xf32>
    %21 = vector.extract_strided_slice %0 {offsets = [0, 3], sizes = [40, 1], strides = [1, 1]} : vector<40x8xi32> to vector<40x1xi32>
    %22 = vector.broadcast %21 : vector<40x1xi32> to vector<40x128xi32>
    %23 = arith.cmpi eq, %22, %1 : vector<40x128xi32>
    %24 = arith.extui %23 : vector<40x128xi1> to vector<40x128xi32>
    %25 = arith.sitofp %24 : vector<40x128xi32> to vector<40x128xf32>
    %26 = arith.addf %20, %25 : vector<40x128xf32>
    %27 = vector.extract_strided_slice %0 {offsets = [0, 4], sizes = [40, 1], strides = [1, 1]} : vector<40x8xi32> to vector<40x1xi32>
    %28 = vector.broadcast %27 : vector<40x1xi32> to vector<40x128xi32>
    %29 = arith.cmpi eq, %28, %1 : vector<40x128xi32>
    %30 = arith.extui %29 : vector<40x128xi1> to vector<40x128xi32>
    %31 = arith.sitofp %30 : vector<40x128xi32> to vector<40x128xf32>
    %32 = arith.addf %26, %31 : vector<40x128xf32>
    %33 = vector.extract_strided_slice %0 {offsets = [0, 5], sizes = [40, 1], strides = [1, 1]} : vector<40x8xi32> to vector<40x1xi32>
    %34 = vector.broadcast %33 : vector<40x1xi32> to vector<40x128xi32>
    %35 = arith.cmpi eq, %34, %1 : vector<40x128xi32>
    %36 = arith.extui %35 : vector<40x128xi1> to vector<40x128xi32>
    %37 = arith.sitofp %36 : vector<40x128xi32> to vector<40x128xf32>
    %38 = arith.addf %32, %37 : vector<40x128xf32>
    %39 = vector.extract_strided_slice %0 {offsets = [0, 6], sizes = [40, 1], strides = [1, 1]} : vector<40x8xi32> to vector<40x1xi32>
    %40 = vector.broadcast %39 : vector<40x1xi32> to vector<40x128xi32>
    %41 = arith.cmpi eq, %40, %1 : vector<40x128xi32>
    %42 = arith.extui %41 : vector<40x128xi1> to vector<40x128xi32>
    %43 = arith.sitofp %42 : vector<40x128xi32> to vector<40x128xf32>
    %44 = arith.addf %38, %43 : vector<40x128xf32>
    %45 = vector.extract_strided_slice %0 {offsets = [0, 7], sizes = [40, 1], strides = [1, 1]} : vector<40x8xi32> to vector<40x1xi32>
    %46 = vector.broadcast %45 : vector<40x1xi32> to vector<40x128xi32>
    %47 = arith.cmpi eq, %46, %1 : vector<40x128xi32>
    %48 = arith.extui %47 : vector<40x128xi1> to vector<40x128xi32>
    %49 = arith.sitofp %48 : vector<40x128xi32> to vector<40x128xf32>
    %50 = arith.addf %44, %49 : vector<40x128xf32>
    %cst_1 = arith.constant 1.250000e-01 : f32
    %51 = vector.broadcast %cst_1 : f32 to vector<40x128xf32>
    %52 = arith.mulf %50, %51 : vector<40x128xf32>
    %c0_2 = arith.constant 0 : index
    %c0_3 = arith.constant 0 : index
    %53 = vector.load %arg2[%c0_2, %c0_3] : memref<128x128xf32, #tpu.memory_space<vmem>>, vector<128x128xf32>
    %cst_4 = arith.constant dense<0.000000e+00> : vector<40x128xf32>
    %54 = tpu.matmul %52, %53, %cst_4 {dimension_numbers = #tpu.dot_dimension_numbers<[1], [0], [0], [1], [0, 0, 1, 1], [], []>} : vector<40x128xf32>, vector<128x128xf32>, vector<40x128xf32> -> vector<40x128xf32>
    %c0_5 = arith.constant 0 : index
    %c0_6 = arith.constant 0 : index
    %55 = vector.load %arg3[%c0_5, %c0_6] : memref<128x128xf32, #tpu.memory_space<vmem>>, vector<128x128xf32>
    %cst_7 = arith.constant dense<0.000000e+00> : vector<40x128xf32>
    %56 = tpu.matmul %54, %55, %cst_7 {dimension_numbers = #tpu.dot_dimension_numbers<[1], [0], [0], [1], [0, 0, 1, 1], [], []>} : vector<40x128xf32>, vector<128x128xf32>, vector<40x128xf32> -> vector<40x128xf32>
    %c0_8 = arith.constant 0 : index
    %c0_9 = arith.constant 0 : index
    %57 = vector.load %arg4[%c0_8, %c0_9] : memref<1x128xf32, #tpu.memory_space<vmem>>, vector<1x128xf32>
    %58 = vector.broadcast %57 : vector<1x128xf32> to vector<40x128xf32>
    %59 = arith.addf %56, %58 : vector<40x128xf32>
    %60 = math.tanh %59 : vector<40x128xf32>
    %61 = vector.extract_strided_slice %60 {offsets = [0, 0], sizes = [8, 128], strides = [1, 1]} : vector<40x128xf32> to vector<8x128xf32>
    %62 = vector.extract_strided_slice %60 {offsets = [8, 0], sizes = [8, 128], strides = [1, 1]} : vector<40x128xf32> to vector<8x128xf32>
    %63 = vector.extract_strided_slice %60 {offsets = [16, 0], sizes = [8, 128], strides = [1, 1]} : vector<40x128xf32> to vector<8x128xf32>
    %64 = vector.extract_strided_slice %60 {offsets = [24, 0], sizes = [8, 128], strides = [1, 1]} : vector<40x128xf32> to vector<8x128xf32>
    %65 = vector.extract_strided_slice %60 {offsets = [32, 0], sizes = [8, 128], strides = [1, 1]} : vector<40x128xf32> to vector<8x128xf32>
    %c0_10 = arith.constant 0 : index
    %c0_11 = arith.constant 0 : index
    %c0_12 = arith.constant 0 : index
    %66 = vector.load %arg5[%c0_10, %c0_11, %c0_12] : memref<3x128x128xf32, #tpu.memory_space<vmem>>, vector<1x128x128xf32>
    %67 = vector.shape_cast %66 : vector<1x128x128xf32> to vector<128x128xf32>
    %cst_13 = arith.constant dense<0.000000e+00> : vector<8x128xf32>
    %68 = tpu.matmul %61, %67, %cst_13 {dimension_numbers = #tpu.dot_dimension_numbers<[1], [0], [0], [1], [0, 0, 1, 1], [], []>} : vector<8x128xf32>, vector<128x128xf32>, vector<8x128xf32> -> vector<8x128xf32>
    %c1 = arith.constant 1 : index
    %c0_14 = arith.constant 0 : index
    %c0_15 = arith.constant 0 : index
    %69 = vector.load %arg5[%c1, %c0_14, %c0_15] : memref<3x128x128xf32, #tpu.memory_space<vmem>>, vector<1x128x128xf32>
    %70 = vector.shape_cast %69 : vector<1x128x128xf32> to vector<128x128xf32>
    %cst_16 = arith.constant dense<0.000000e+00> : vector<8x128xf32>
    %71 = tpu.matmul %62, %70, %cst_16 {dimension_numbers = #tpu.dot_dimension_numbers<[1], [0], [0], [1], [0, 0, 1, 1], [], []>} : vector<8x128xf32>, vector<128x128xf32>, vector<8x128xf32> -> vector<8x128xf32>
    %72 = arith.addf %68, %71 : vector<8x128xf32>
    %c2 = arith.constant 2 : index
    %c0_17 = arith.constant 0 : index
    %c0_18 = arith.constant 0 : index
    %73 = vector.load %arg5[%c2, %c0_17, %c0_18] : memref<3x128x128xf32, #tpu.memory_space<vmem>>, vector<1x128x128xf32>
    %74 = vector.shape_cast %73 : vector<1x128x128xf32> to vector<128x128xf32>
    %cst_19 = arith.constant dense<0.000000e+00> : vector<8x128xf32>
    %75 = tpu.matmul %63, %74, %cst_19 {dimension_numbers = #tpu.dot_dimension_numbers<[1], [0], [0], [1], [0, 0, 1, 1], [], []>} : vector<8x128xf32>, vector<128x128xf32>, vector<8x128xf32> -> vector<8x128xf32>
    %76 = arith.addf %72, %75 : vector<8x128xf32>
    %c0_20 = arith.constant 0 : index
    %c0_21 = arith.constant 0 : index
    %77 = vector.load %arg6[%c0_20, %c0_21] : memref<1x128xf32, #tpu.memory_space<vmem>>, vector<1x128xf32>
    %78 = vector.broadcast %77 : vector<1x128xf32> to vector<8x128xf32>
    %79 = arith.addf %76, %78 : vector<8x128xf32>
    %80 = arith.mulf %79, %79 : vector<8x128xf32>
    %cst_22 = arith.constant dense<0.000000e+00> : vector<8xf32>
    %81 = vector.multi_reduction <add>, %80, %cst_22 [1] : vector<8x128xf32> to vector<8xf32>
    %82 = vector.shape_cast %81 : vector<8xf32> to vector<8x1xf32>
    %83 = arith.mulf %64, %64 : vector<8x128xf32>
    %cst_23 = arith.constant dense<0.000000e+00> : vector<8xf32>
    %84 = vector.multi_reduction <add>, %83, %cst_23 [1] : vector<8x128xf32> to vector<8xf32>
    %85 = vector.shape_cast %84 : vector<8xf32> to vector<8x1xf32>
    %86 = arith.mulf %65, %65 : vector<8x128xf32>
    %cst_24 = arith.constant dense<0.000000e+00> : vector<8xf32>
    %87 = vector.multi_reduction <add>, %86, %cst_24 [1] : vector<8x128xf32> to vector<8xf32>
    %88 = vector.shape_cast %87 : vector<8xf32> to vector<8x1xf32>
    %89 = arith.mulf %79, %64 : vector<8x128xf32>
    %cst_25 = arith.constant dense<0.000000e+00> : vector<8xf32>
    %90 = vector.multi_reduction <add>, %89, %cst_25 [1] : vector<8x128xf32> to vector<8xf32>
    %91 = vector.shape_cast %90 : vector<8xf32> to vector<8x1xf32>
    %92 = arith.mulf %82, %85 : vector<8x1xf32>
    %cst_26 = arith.constant 9.99999996E-13 : f32
    %93 = vector.broadcast %cst_26 : f32 to vector<8x1xf32>
    %94 = arith.maximumf %92, %93 : vector<8x1xf32>
    %95 = math.rsqrt %94 : vector<8x1xf32>
    %96 = arith.mulf %91, %95 : vector<8x1xf32>
    %97 = arith.mulf %79, %65 : vector<8x128xf32>
    %cst_27 = arith.constant dense<0.000000e+00> : vector<8xf32>
    %98 = vector.multi_reduction <add>, %97, %cst_27 [1] : vector<8x128xf32> to vector<8xf32>
    %99 = vector.shape_cast %98 : vector<8xf32> to vector<8x1xf32>
    %100 = arith.mulf %82, %88 : vector<8x1xf32>
    %cst_28 = arith.constant 9.99999996E-13 : f32
    %101 = vector.broadcast %cst_28 : f32 to vector<8x1xf32>
    %102 = arith.maximumf %100, %101 : vector<8x1xf32>
    %103 = math.rsqrt %102 : vector<8x1xf32>
    %104 = arith.mulf %99, %103 : vector<8x1xf32>
    %105 = tpu.iota {dimensions = array<i32: 1>} : vector<8x128xi32>
    %c0_i32 = arith.constant 0 : i32
    %106 = vector.broadcast %c0_i32 : i32 to vector<8x128xi32>
    %107 = arith.cmpi eq, %105, %106 : vector<8x128xi32>
    %c1_i32 = arith.constant 1 : i32
    %108 = vector.broadcast %c1_i32 : i32 to vector<8x128xi32>
    %109 = arith.cmpi eq, %105, %108 : vector<8x128xi32>
    %cst_29 = arith.constant 0.000000e+00 : f32
    %110 = vector.shape_cast %104 : vector<8x1xf32> to vector<8x1xf32>
    %111 = vector.broadcast %110 : vector<8x1xf32> to vector<8x128xf32>
    %112 = vector.broadcast %cst_29 : f32 to vector<8x128xf32>
    %113 = arith.select %109, %111, %112 : vector<8x128xi1>, vector<8x128xf32>
    %114 = vector.shape_cast %96 : vector<8x1xf32> to vector<8x1xf32>
    %115 = vector.broadcast %114 : vector<8x1xf32> to vector<8x128xf32>
    %116 = arith.select %107, %115, %113 : vector<8x128xi1>, vector<8x128xf32>
    %c0_30 = arith.constant 0 : index
    %c0_31 = arith.constant 0 : index
    %117 = vector.load %arg7[%c0_30, %c0_31] : memref<8x128xf32, #tpu.memory_space<vmem>>, vector<8x128xf32>
    tpu.vector_store %arg7[%c0_30, %c0_31], %116 {strides = array<i32>} : memref<8x128xf32, #tpu.memory_space<vmem>>, vector<8x128xf32>,
    return
  }
  func.func @transform_0(%arg0: i32) -> (i32, i32) {
    %c0_i32 = arith.constant 0 : i32
    %c0_i32_0 = arith.constant 0 : i32
    %c0_i32_1 = arith.constant 0 : i32
    return %c0_i32, %c0_i32_0 : i32, i32
  }
  func.func @transform_1(%arg0: i32) -> (i32, i32) {
    %c0_i32 = arith.constant 0 : i32
    %c0_i32_0 = arith.constant 0 : i32
    %c0_i32_1 = arith.constant 0 : i32
    return %c0_i32, %c0_i32_0 : i32, i32
  }
  func.func @transform_2(%arg0: i32) -> (i32, i32) {
    %c0_i32 = arith.constant 0 : i32
    %c0_i32_0 = arith.constant 0 : i32
    %c0_i32_1 = arith.constant 0 : i32
    return %c0_i32, %c0_i32_0 : i32, i32
  }
  func.func @transform_3(%arg0: i32) -> (i32, i32) {
    %c0_i32 = arith.constant 0 : i32
    %c0_i32_0 = arith.constant 0 : i32
    %c0_i32_1 = arith.constant 0 : i32
    return %c0_i32, %c0_i32_0 : i32, i32
  }
  func.func @transform_4(%arg0: i32) -> (i32, i32, i32) {
    %c0_i32 = arith.constant 0 : i32
    %c0_i32_0 = arith.constant 0 : i32
    %c0_i32_1 = arith.constant 0 : i32
    %c0_i32_2 = arith.constant 0 : i32
    return %c0_i32, %c0_i32_0, %c0_i32_1 : i32, i32, i32
  }
  func.func @transform_5(%arg0: i32) -> (i32, i32) {
    %c0_i32 = arith.constant 0 : i32
    %c0_i32_0 = arith.constant 0 : i32
    %c0_i32_1 = arith.constant 0 : i32
    return %c0_i32, %c0_i32_0 : i32, i32
  }
  func.func @transform_6(%arg0: i32) -> (i32, i32) {
    %c0_i32 = arith.constant 0 : i32
    %c0_i32_0 = arith.constant 0 : i32
    %c0_i32_1 = arith.constant 0 : i32
    return %c0_i32, %c0_i32_0 : i32, i32
  }
}

</mosaic_0001>

<bundles_post_ra>
// kernel: mmscs_forward.1
= control target key start
LH: loop header
LB: loop body
LE: loop exit
PB: predicated region body
PF: predicated region fallthrough
CT: control target
= control target key end

     0   :  { %11 = vsyncpa [#allocation3], 0  ;;  %s1430_s21 = smov [#allocation2]   ;;  %s1931_s0 = inlined_call_operand.vmem [shape: s32[40,8], index: 0, kind: input, shape index: {}]   ;;  %s1932_s1 = inlined_call_operand.vmem [shape: f32[128,128], index: 1, kind: input, shape index: {}]   ;;  %s1933_s2 = inlined_call_operand.hbm [shape: f32[128,128], index: 2, kind: input, shape index: {}]   ;;  %s1934_s3 = inlined_call_operand.vmem [shape: f32[1,128], index: 3, kind: input, shape index: {}]   ;;  %s1935_s4 = inlined_call_operand.vmem [shape: f32[3,128,128], index: 4, kind: input, shape index: {}]   ;;  %s1936_s5 = inlined_call_operand.vmem [shape: f32[1,128], index: 5, kind: input, shape index: {}]   ;;  %s1937_s6 = inlined_call_operand.vmem [shape: f32[8,128], index: 6, kind: output, shape index: {}]  }
   0x1   :  { %s21_s22 = sshll.u32 %s1430_s21, 4  ;;  %s1406_s25 = scalar_lea.hbm %s1933_s2, 2048  ;;  %s22_s22 = int_to_ptr.vmem [resolvable:$true] %s21_s22 }
   0x2   :  { %p1407_p0 = scmp.ne.s32.totalorder %s1933_s2, %s1406_s25  ;;  %p1410_p1 = scmp.lt.u32.totalorder %s1406_s25, %s1933_s2 }
   0x4   :  { %p1412_p2 = pnand %p1410_p1, %p1407_p0 }
   0x6   :  { %1415 = shalt.err (!%p1412_p2)
}
   0x7   :  { %s1416_s30 = scalar_lea.vmem %s22_s22, 2048  ;;  %p1421_p4 = scmp.lt.s32.totalorder %s22_s22, %s22_s22 }
   0x8   :  { %p1417_p3 = scmp.ne.s32.totalorder %s22_s22, %s1416_s30  ;;  %p1422_p5 = scmp.lt.s32.totalorder %s1416_s30, %s1416_s30 }
   0xa   :  { %p1423_p6 = por %p1422_p5, %p1421_p4 }
   0xc   :  { %p1424_p7 = pnand %p1423_p6, %p1417_p3 }
   0xe   :  { %1427 = shalt.err (!%p1424_p7)
}
   0xf   :  { %s1431_s7 = smov 128   ;;  %s1432_s8 = smov 8  }
  0x10   :  { %27 = dma.hbm_to_vmem [thread:$0]  %s1933_s2, 2048, %s22_s22, [#allocation3], %s1431_s7, %s1431_s7, %s1432_s8  }
  0x11   :  { %1428 = dma.done.wait [#allocation3], 2048  }
  0x12   :  { %1429 = vsyncadd [#allocation3], 4294965248  ;;  %v1433_v0 = vmov 2   ;;  %v1434_v1 = vmov 0   ;;  %v1496_v2 = vld [vmem:[%s1931_s0] sm:$0xff]  ;;  %v1503_v3 = vld [vmem:[%s1931_s0 + $0x8] sm:$0xff] }
  0x13   :  { %1357 = vset.pattern.permute.xlu1 %v1433_v0  ;;  %1355 = vset.pattern.permute.xlu0 %v1434_v1  ;;  %v1435_v4 = vmov 1   ;;  %v329_v5 = vld [vmem:[%s1932_s1] sm:$0xff]  ;;  %v330_v6 = vld [vmem:[%s1932_s1 + $0x8] sm:$0xff]  ;;  %v1436_v8 = vmov 0.0|0.0   ;;  %v331_v9 = vld [vmem:[%s1932_s1 + $0x10] sm:$0xff]  ;;  %v1437_v11 = vmov 3  }
  0x14   :  { %115 = vperm.xlu1 %1357, %v1496_v2   ;;  %45 = vperm.xlu0 %1355, %v1496_v2   ;;  %v1222_v7 = vpack.c.bf16 %v330_v6, %v329_v5  ;;  %v332_v10 = vld [vmem:[%s1932_s1 + $0x18] sm:$0xff]  ;;  %v333_v13 = vld [vmem:[%s1932_s1 + $0x20] sm:$0xff]  ;;  %v334_v14 = vld [vmem:[%s1932_s1 + $0x28] sm:$0xff]  ;;  %v1438_v19 = vmov 4   ;;  %v1439_v23 = vmov 7   ;;  %v1440_v24 = vmov 5  }
  0x15   :  { %1221 = vmatprep.subr.bf16.mxu0 %v1436_v8  ;;  %1245 = vmatprep.subr.bf16.mxu1 %v1436_v8  ;;  %v1225_v12 = vpack.c.bf16 %v332_v10, %v331_v9  ;;  %v1228_v15 = vpack.c.bf16 %v334_v14, %v333_v13  ;;  %v335_v16 = vld [vmem:[%s1932_s1 + $0x30] sm:$0xff]  ;;  %v336_v17 = vld [vmem:[%s1932_s1 + $0x38] sm:$0xff]  ;;  %v337_v20 = vld [vmem:[%s1932_s1 + $0x40] sm:$0xff]  ;;  %v1441_v31 = vmov 6   ;;  %vm1442_vm0 = vmmov 0  }
  0x16   :  { %1223 = vmatpush3.bf16.msra.mxu0 %v1222_v7  ;;  %v1231_v18 = vpack.c.bf16 %v336_v17, %v335_v16  ;;  %v338_v21 = vld [vmem:[%s1932_s1 + $0x48] sm:$0xff]  ;;  %v339_v25 = vld [vmem:[%s1932_s1 + $0x50] sm:$0xff]  ;;  %v340_v26 = vld [vmem:[%s1932_s1 + $0x58] sm:$0xff]  ;;  %v1443_v36 = vmov 0.0  }
  0x17   :  { %1224 = vmatprep.subr.bf16.mxu0 %v1436_v8  ;;  %v1234_v22 = vpack.c.bf16 %v338_v21, %v337_v20  ;;  %v1237_v27 = vpack.c.bf16 %v340_v26, %v339_v25  ;;  %v39_v28 = vld [vmem:[%s1931_s0 + $0x10] sm:$0xff]  ;;  %v341_v29 = vld [vmem:[%s1932_s1 + $0x60] sm:$0xff]  ;;  %v342_v30 = vld [vmem:[%s1932_s1 + $0x68] sm:$0xff]  ;;  %1054 = vmatprep.mubr.msk.f32.mxu0 %vm1442_vm0, %v1443_v36 }
  0x18   :  { %1358 = vset.pattern.permute.xlu1 %v1434_v1  ;;  %1356 = vset.pattern.permute.xlu0 %v1435_v4  ;;  %v1240_v32 = vpack.c.bf16 %v342_v30, %v341_v29  ;;  %v343_v33 = vld [vmem:[%s1932_s1 + $0x70] sm:$0xff]  ;;  %v344_v34 = vld [vmem:[%s1932_s1 + $0x78] sm:$0xff]  ;;  %v435_v38 = vld [vmem:[#allocation2] sm:$0xff] }
  0x19   :  { %48 = vperm.xlu1 %1358, %v1503_v3   ;;  %80 = vperm.xlu0 %1356, %v1496_v2   ;;  %v1243_v35 = vpack.c.bf16 %v344_v34, %v343_v33  ;;  %v1610_v37 = vld [vmem:[%s1931_s0 + $0x18] sm:$0xff]  ;;  %v436_v39 = vld [vmem:[#allocation2 + $0x8] sm:$0xff]  ;;  %v41_v41 = vld [vmem:[%s1931_s0 + $0x20] sm:$0xff] }
  0x1a   :  { %1226 = vmatpush3.bf16.msra.mxu0 %v1225_v12  ;;  %1101 = vmatprep.mubr.msk.f32.mxu1 %vm1442_vm0, %v1443_v36  ;;  %v1246_v40 = vpack.c.bf16 %v436_v39, %v435_v38  ;;  %v437_v42 = vld [vmem:[#allocation2 + $0x10] sm:$0xff]  ;;  %v438_v43 = vld [vmem:[#allocation2 + $0x18] sm:$0xff]  ;;  %v439_v45 = vld [vmem:[#allocation2 + $0x20] sm:$0xff] }
  0x1b   :  { %1227 = vmatprep.subr.bf16.mxu0 %v1436_v8  ;;  %v1249_v44 = vpack.c.bf16 %v438_v43, %v437_v42  ;;  %v440_v46 = vld [vmem:[#allocation2 + $0x28] sm:$0xff]  ;;  %v441_v48 = vld [vmem:[#allocation2 + $0x30] sm:$0xff]  ;;  %v442_v49 = vld [vmem:[#allocation2 + $0x38] sm:$0xff] }
  0x1c   :  { %1247 = vmatpush3.bf16.msra.mxu1 %v1246_v40  ;;  %v1252_v47 = vpack.c.bf16 %v440_v46, %v439_v45  ;;  %v1255_v50 = vpack.c.bf16 %v442_v49, %v441_v48  ;;  %v443_v51 = vld [vmem:[#allocation2 + $0x40] sm:$0xff]  ;;  %v444_v52 = vld [vmem:[#allocation2 + $0x48] sm:$0xff]  ;;  %v445_v54 = vld [vmem:[#allocation2 + $0x50] sm:$0xff] }
  0x1d   :  { %1359 = vset.pattern.permute.xlu1 %v1435_v4  ;;  %1360 = vset.pattern.permute.xlu0 %v1437_v11  ;;  %v1258_v53 = vpack.c.bf16 %v444_v52, %v443_v51  ;;  %v446_v55 = vld [vmem:[#allocation2 + $0x58] sm:$0xff]  ;;  %v447_v57 = vld [vmem:[#allocation2 + $0x60] sm:$0xff]  ;;  %v448_v58 = vld [vmem:[#allocation2 + $0x68] sm:$0xff] }
  0x1e   :  { %83 = vperm.xlu1 %1359, %v1503_v3   ;;  %150 = vperm.xlu0 %1360, %v1496_v2   ;;  %v1261_v56 = vpack.c.bf16 %v446_v55, %v445_v54  ;;  %v1264_v59 = vpack.c.bf16 %v448_v58, %v447_v57  ;;  %v449_v60 = vld [vmem:[#allocation2 + $0x70] sm:$0xff]  ;;  %v450_v61 = vld [vmem:[#allocation2 + $0x78] sm:$0xff] }
  0x1f   :  { %1229 = vmatpush3.bf16.msra.mxu0 %v1228_v15  ;;  %1248 = vmatprep.subr.bf16.mxu1 %v1436_v8  ;;  %v1267_v62 = vpack.c.bf16 %v450_v61, %v449_v60 }
  0x20   :  { %1230 = vmatprep.subr.bf16.mxu0 %v1436_v8  ;;  %1250 = vmatpush3.bf16.msra.mxu1 %v1249_v44 }
  0x21   :  { %1251 = vmatprep.subr.bf16.mxu1 %v1436_v8 }
  0x22   :  { %1361 = vset.pattern.permute.xlu1 %v1433_v0  ;;  %153 = vperm.xlu0 %1360, %v1503_v3  }
  0x23   :  { %118 = vperm.xlu1 %1361, %v1503_v3   ;;  %1232 = vmatpush3.bf16.msra.mxu0 %v1231_v18 }
  0x24   :  { %1233 = vmatprep.subr.bf16.mxu0 %v1436_v8  ;;  %1253 = vmatpush3.bf16.msra.mxu1 %v1252_v47 }
  0x25   :  { %1254 = vmatprep.subr.bf16.mxu1 %v1436_v8 }
  0x26   :  { %1364 = vset.pattern.permute.xlu0 %v1438_v19 }
  0x27   :  { %1362 = vset.pattern.permute.xlu1 %v1438_v19  ;;  %188 = vperm.xlu0 %1364, %v1503_v3  }
  0x28   :  { %185 = vperm.xlu1 %1362, %v1496_v2   ;;  %1235 = vmatpush3.bf16.msra.mxu0 %v1234_v22 }
  0x29   :  { %1236 = vmatprep.subr.bf16.mxu0 %v1436_v8  ;;  %1256 = vmatpush3.bf16.msra.mxu1 %v1255_v50 }
  0x2a   :  { %1257 = vmatprep.subr.bf16.mxu1 %v1436_v8 }
  0x2b   :  { %1367 = vset.pattern.permute.xlu0 %v1439_v23 }
  0x2c   :  { %1363 = vset.pattern.permute.xlu1 %v1440_v24  ;;  %290 = vperm.xlu0 %1367, %v1496_v2  }
  0x2d   :  { %220 = vperm.xlu1 %1363, %v1496_v2   ;;  %1238 = vmatpush3.bf16.msra.mxu0 %v1237_v27 }
  0x2e   :  { %1239 = vmatprep.subr.bf16.mxu0 %v1436_v8  ;;  %1259 = vmatpush3.bf16.msra.mxu1 %v1258_v53 }
  0x2f   :  { %1260 = vmatprep.subr.bf16.mxu1 %v1436_v8 }
  0x30   :  { %1370 = vset.pattern.permute.xlu0 %v1434_v1 }
  0x31   :  { %1365 = vset.pattern.permute.xlu1 %v1441_v31  ;;  %51 = vperm.xlu0 %1370, %v39_v28  }
  0x32   :  { %255 = vperm.xlu1 %1365, %v1496_v2   ;;  %1241 = vmatpush3.bf16.msra.mxu0 %v1240_v32 }
  0x33   :  { %1242 = vmatprep.subr.bf16.mxu0 %v1436_v8  ;;  %1262 = vmatpush3.bf16.msra.mxu1 %v1261_v56 }
  0x34   :  { %1263 = vmatprep.subr.bf16.mxu1 %v1436_v8 }
  0x35   :  { %1373 = vset.pattern.permute.xlu0 %v1437_v11 }
  0x36   :  { %1366 = vset.pattern.permute.xlu1 %v1440_v24  ;;  %156 = vperm.xlu0 %1373, %v39_v28  }
  0x37   :  { %223 = vperm.xlu1 %1366, %v1503_v3   ;;  %1244 = vmatpush3.bf16.msra.mxu0 %v1243_v35 }
  0x38   :  { %1269 = vmatprep.subr.bf16.mxu0 %v1436_v8  ;;  %1265 = vmatpush3.bf16.msra.mxu1 %v1264_v59 }
  0x39   :  { %1266 = vmatprep.subr.bf16.mxu1 %v1436_v8 }
  0x3a   :  { %1376 = vset.pattern.permute.xlu0 %v1441_v31 }
  0x3b   :  { %1368 = vset.pattern.permute.xlu1 %v1441_v31  ;;  %261 = vperm.xlu0 %1376, %v39_v28  }
  0x3c   :  { %258 = vperm.xlu1 %1368, %v1503_v3   ;;  %1268 = vmatpush3.bf16.msra.mxu1 %v1267_v62 }
  0x3d   :  { %1293 = vmatprep.subr.bf16.mxu1 %v1436_v8 }
  0x3f   :  { %1379 = vset.pattern.permute.xlu0 %v1435_v4 }
  0x40   :  { %1369 = vset.pattern.permute.xlu1 %v1439_v23  ;;  %89 = vperm.xlu0 %1379, %v1610_v37  }
  0x41   :  { %293 = vperm.xlu1 %1369, %v1503_v3   ;;  %v42_v3 = vlaneseq }
  0x43   :  { %v1643_v6 = vand.u32 127, %v42_v3 }
  0x44   :  { %92 = vperm.xlu0 %1379, %v41_v41  }
  0x45   :  { %1371 = vset.pattern.permute.xlu1 %v1435_v4 }
  0x46   :  { %86 = vperm.xlu1 %1371, %v39_v28  }
  0x48   :  { %1383 = vset.pattern.permute.xlu0 %v1433_v0 }
  0x49   :  { %127 = vperm.xlu0 %1383, %v41_v41  }
  0x4a   :  { %1372 = vset.pattern.permute.xlu1 %v1433_v0 }
  0x4b   :  { %121 = vperm.xlu1 %1372, %v39_v28  }
  0x4d   :  { %1386 = vset.pattern.permute.xlu0 %v1440_v24 }
  0x4e   :  { %229 = vperm.xlu0 %1386, %v1610_v37  }
  0x4f   :  { %1374 = vset.pattern.permute.xlu1 %v1438_v19 }
  0x50   :  { %191 = vperm.xlu1 %1374, %v39_v28  }
  0x52   :  { %232 = vperm.xlu0 %1386, %v41_v41  }
  0x54   :  { %1375 = vset.pattern.permute.xlu1 %v1440_v24 }
  0x55   :  { %226 = vperm.xlu1 %1375, %v39_v28  }
  0x56   :  { %1390 = vset.pattern.permute.xlu0 %v1441_v31 }
  0x57   :  { %267 = vperm.xlu0 %1390, %v41_v41  }
  0x59   :  { %1377 = vset.pattern.permute.xlu1 %v1439_v23 }
  0x5a   :  { %296 = vperm.xlu1 %1377, %v39_v28  }
  0x5b   :  { %1391 = vset.pattern.permute.xlu0 %v1439_v23 }
  0x5e   :  { %1378 = vset.pattern.permute.xlu1 %v1434_v1 }
  0x5f   :  { %54 = vperm.xlu1 %1378, %v1610_v37  }
  0x63   :  { %1380 = vset.pattern.permute.xlu1 %v1433_v0 }
  0x64   :  { %124 = vperm.xlu1 %1380, %v1610_v37  }
  0x68   :  { %1381 = vset.pattern.permute.xlu1 %v1434_v1 }
  0x69   :  { %57 = vperm.xlu1 %1381, %v41_v41  }
  0x6d   :  { %1382 = vset.pattern.permute.xlu1 %v1437_v11 }
  0x6e   :  { %159 = vperm.xlu1 %1382, %v1610_v37  }
  0x72   :  { %1384 = vset.pattern.permute.xlu1 %v1438_v19 }
  0x73   :  { %194 = vperm.xlu1 %1384, %v1610_v37  }
  0x77   :  { %1385 = vset.pattern.permute.xlu1 %v1437_v11 }
  0x78   :  { %162 = vperm.xlu1 %1385, %v41_v41  }
  0x7c   :  { %1387 = vset.pattern.permute.xlu1 %v1438_v19 }
  0x7d   :  { %197 = vperm.xlu1 %1387, %v41_v41  }
  0x81   :  { %1388 = vset.pattern.permute.xlu1 %v1441_v31 }
  0x82   :  { %264 = vperm.xlu1 %1388, %v1610_v37  }
  0x86   :  { %1389 = vset.pattern.permute.xlu1 %v1439_v23 }
  0x87   :  { %299 = vperm.xlu1 %1389, %v1610_v37  }
  0x8b   :  { %302 = vperm.xlu1 %1389, %v41_v41  }
  0x93   :  { %v116_v63 = vpop.permute.xlu1 %115  ;;  %v46_v0 = vpop.permute.xlu0 %45 }
  0x94   :  { %vm59_vm1 = vcmp.eq.s32.totalorder %v46_v0, %v1643_v6  ;;  %vm129_vm3 = vcmp.eq.s32.totalorder %v116_v63, %v1643_v6 }
  0x95   :  { %v855_v9 = vsel %vm59_vm1, 1.0, %v1443_v36  ;;  %v865_v14 = vsel %vm129_vm3, 1.0, %v1443_v36 }
  0x98   :  { %v49_v1 = vpop.permute.xlu1 %48  ;;  %v81_v2 = vpop.permute.xlu0 %80 }
  0x99   :  { %vm94_vm2 = vcmp.eq.s32.totalorder %v81_v2, %v1643_v6  ;;  %vm60_vm8 = vcmp.eq.s32.totalorder %v49_v1, %v1643_v6 }
  0x9a   :  { %v860_v10 = vsel %vm94_vm2, 1.0, %v1443_v36  ;;  %v856_v26 = vsel %vm60_vm8, 1.0, %v1443_v36 }
  0x9b   :  { %v109_v12 = vadd.f32 %v860_v10, %v855_v9 }
  0x9d   :  { %v84_v4 = vpop.permute.xlu1 %83  ;;  %v151_v5 = vpop.permute.xlu0 %150  ;;  %v144_v16 = vadd.f32 %v865_v14, %v109_v12 }
  0x9e   :  { %vm164_vm4 = vcmp.eq.s32.totalorder %v151_v5, %v1643_v6  ;;  %vm95_vm6 = vcmp.eq.s32.totalorder %v84_v4, %v1643_v6 }
  0x9f   :  { %v870_v17 = vsel %vm164_vm4, 1.0, %v1443_v36  ;;  %v861_v23 = vsel %vm95_vm6, 1.0, %v1443_v36 }
  0xa0   :  { %v179_v21 = vadd.f32 %v870_v17, %v144_v16  ;;  %v110_v29 = vadd.f32 %v861_v23, %v856_v26 }
  0xa1   :  { %v154_v11 = vpop.permute.xlu0 %153 }
  0xa2   :  { %v119_v7 = vpop.permute.xlu1 %118  ;;  %vm165_vm12 = vcmp.eq.s32.totalorder %v154_v11, %v1643_v6 }
  0xa3   :  { %vm130_vm9 = vcmp.eq.s32.totalorder %v119_v7, %v1643_v6  ;;  %v871_v34 = vsel %vm165_vm12, 1.0, %v1443_v36 }
  0xa4   :  { %v866_v27 = vsel %vm130_vm9, 1.0, %v1443_v36 }
  0xa5   :  { %v145_v33 = vadd.f32 %v866_v27, %v110_v29 }
  0xa6   :  { %v189_v15 = vpop.permute.xlu0 %188 }
  0xa7   :  { %v186_v13 = vpop.permute.xlu1 %185  ;;  %vm200_vm13 = vcmp.eq.s32.totalorder %v189_v15, %v1643_v6  ;;  %v180_v39 = vadd.f32 %v871_v34, %v145_v33 }
  0xa8   :  { %vm199_vm5 = vcmp.eq.s32.totalorder %v186_v13, %v1643_v6  ;;  %v876_v40 = vsel %vm200_vm13, 1.0, %v1443_v36 }
  0xa9   :  { %v875_v19 = vsel %vm199_vm5, 1.0, %v1443_v36  ;;  %v215_v43 = vadd.f32 %v876_v40, %v180_v39 }
  0xaa   :  { %v214_v24 = vadd.f32 %v875_v19, %v179_v21 }
  0xab   :  { %v291_v20 = vpop.permute.xlu0 %290 }
  0xac   :  { %v221_v18 = vpop.permute.xlu1 %220  ;;  %vm304_vm10 = vcmp.eq.s32.totalorder %v291_v20, %v1643_v6 }
  0xad   :  { %vm234_vm7 = vcmp.eq.s32.totalorder %v221_v18, %v1643_v6  ;;  %v890_v31 = vsel %vm304_vm10, 1.0, %v1443_v36 }
  0xae   :  { %v880_v22 = vsel %vm234_vm7, 1.0, %v1443_v36 }
  0xaf   :  { %v249_v28 = vadd.f32 %v880_v22, %v214_v24 }
  0xb0   :  { %v52_v47 = vpop.permute.xlu0 %51 }
  0xb1   :  { %v256_v25 = vpop.permute.xlu1 %255  ;;  %vm61_vm2 = vcmp.eq.s32.totalorder %v52_v47, %v1643_v6 }
  0xb2   :  { %vm269_vm11 = vcmp.eq.s32.totalorder %v256_v25, %v1643_v6  ;;  %v857_v53 = vsel %vm61_vm2, 1.0, %v1443_v36 }
  0xb3   :  { %v885_v30 = vsel %vm269_vm11, 1.0, %v1443_v36 }
  0xb4   :  { %v284_v32 = vadd.f32 %v885_v30, %v249_v28 }
  0xb5   :  { %v157_v54 = vpop.permute.xlu0 %156 }
  0xb6   :  { %v319_v35 = vadd.f32 %v890_v31, %v284_v32  ;;  %v224_v37 = vpop.permute.xlu1 %223  ;;  %vm166_vm4 = vcmp.eq.s32.totalorder %v157_v54, %v1643_v6 }
  0xb7   :  { %vm235_vm14 = vcmp.eq.s32.totalorder %v224_v37, %v1643_v6  ;;  %v872_v59 = vsel %vm166_vm4, 1.0, %v1443_v36 }
  0xb8   :  { %v324_v38 = vmul.f32 0.125, %v319_v35  ;;  %v881_v42 = vsel %vm235_vm14, 1.0, %v1443_v36 }
  0xb9   :  { %v250_v45 = vadd.f32 %v881_v42, %v215_v43 }
  0xba   :  { %1055 = vmatmul.mubr.f32.vlgmr.msra.gmra.mrb[0].mxu0 %v324_v38  ;;  %v262_v63 = vpop.permute.xlu0 %261 }
  0xbb   :  { %v259_v41 = vpop.permute.xlu1 %258  ;;  %1057 = vmatprep.mubr.msk.f32.mxu0 %vm1442_vm0, %v1443_v36  ;;  %vm271_vm7 = vcmp.eq.s32.totalorder %v262_v63, %v1643_v6  ;;  %v897_v63 = vld [vmem:[%s1935_s4 + $0x88] sm:$0xff] }
  0xbc   :  { %vm270_vm15 = vcmp.eq.s32.totalorder %v259_v41, %v1643_v6  ;;  %v887_v4 = vsel %vm271_vm7, 1.0, %v1443_v36 }
  0xbd   :  { %v886_v44 = vsel %vm270_vm15, 1.0, %v1443_v36 }
  0xbe   :  { %v285_v48 = vadd.f32 %v886_v44, %v250_v45 }
  0xbf   :  { %v90_v16 = vpop.permute.xlu0 %89 }
  0xc0   :  { %v294_v46 = vpop.permute.xlu1 %293  ;;  %vm97_vm11 = vcmp.eq.s32.totalorder %v90_v16, %v1643_v6 }
  0xc1   :  { %vm305_vm1 = vcmp.eq.s32.totalorder %v294_v46, %v1643_v6  ;;  %v863_v19 = vsel %vm97_vm11, 1.0, %v1443_v36  ;;  %vm845_vm11 = vcmp.eq.s32.totalorder %v1643_v6, 0 }
  0xc2   :  { %v891_v49 = vsel %vm305_vm1, 1.0, %v1443_v36 }
  0xc3   :  { %v320_v50 = vadd.f32 %v891_v49, %v285_v48  ;;  %v93_v20 = vpop.permute.xlu0 %92 }
  0xc4   :  { %vm98_vm15 = vcmp.eq.s32.totalorder %v93_v20, %v1643_v6  ;;  %v561_v20 = vld [vmem:[%s1935_s4 + $0x40] sm:$0xff] }
  0xc5   :  { %v325_v51 = vmul.f32 0.125, %v320_v50  ;;  %v87_v52 = vpop.permute.xlu1 %86  ;;  %v864_v29 = vsel %vm98_vm15, 1.0, %v1443_v36 }
  0xc6   :  { %vm96_vm3 = vcmp.eq.s32.totalorder %v87_v52, %v1643_v6 }
  0xc7   :  { %1058 = vmatmul.mubr.f32.gmra.mrb[2].mxu0 %v325_v51  ;;  %v862_v55 = vsel %vm96_vm3, 1.0, %v1443_v36 }
  0xc8   :  { %1060 = vmatprep.mubr.msk.f32.mxu0 %vm1442_vm0, %v1443_v36  ;;  %v111_v56 = vadd.f32 %v862_v55, %v857_v53  ;;  %v128_v24 = vpop.permute.xlu0 %127 }
  0xc9   :  { %vm133_vm2 = vcmp.eq.s32.totalorder %v128_v24, %v1643_v6 }
  0xca   :  { %v122_v57 = vpop.permute.xlu1 %121  ;;  %v869_v34 = vsel %vm133_vm2, 1.0, %v1443_v36 }
  0xcb   :  { %vm131_vm5 = vcmp.eq.s32.totalorder %v122_v57, %v1643_v6 }
  0xcc   :  { %v867_v58 = vsel %vm131_vm5, 1.0, %v1443_v36 }
  0xcd   :  { %v146_v60 = vadd.f32 %v867_v58, %v111_v56  ;;  %v230_v32 = vpop.permute.xlu0 %229 }
  0xce   :  { %vm237_vm3 = vcmp.eq.s32.totalorder %v230_v32, %v1643_v6 }
  0xcf   :  { %v181_v61 = vadd.f32 %v872_v59, %v146_v60  ;;  %v192_v62 = vpop.permute.xlu1 %191  ;;  %v883_v38 = vsel %vm237_vm3, 1.0, %v1443_v36 }
  0xd0   :  { %vm201_vm6 = vcmp.eq.s32.totalorder %v192_v62, %v1643_v6  ;;  %v896_v62 = vld [vmem:[%s1935_s4 + $0x80] sm:$0xff] }
  0xd1   :  { %v877_v0 = vsel %vm201_vm6, 1.0, %v1443_v36  ;;  %v233_v46 = vpop.permute.xlu0 %232 }
  0xd2   :  { %v216_v1 = vadd.f32 %v877_v0, %v181_v61  ;;  %vm238_vm7 = vcmp.eq.s32.totalorder %v233_v46, %v1643_v6  ;;  %v1270_v0 = vpack.c.bf16 %v897_v63, %v896_v62 }
  0xd3   :  { %v884_v50 = vsel %vm238_vm7, 1.0, %v1443_v36 }
  0xd4   :  { %v227_v2 = vpop.permute.xlu1 %226  ;;  %1271 = vmatpush3.bf16.msra.mxu0 %v1270_v0 }
  0xd5   :  { %vm236_vm8 = vcmp.eq.s32.totalorder %v227_v2, %v1643_v6  ;;  %v899_v2 = vld [vmem:[%s1935_s4 + $0x98] sm:$0xff]  ;;  %1272 = vmatprep.subr.bf16.mxu0 %v1436_v8 }
  0xd6   :  { %v882_v3 = vsel %vm236_vm8, 1.0, %v1443_v36  ;;  %v268_v55 = vpop.permute.xlu0 %267 }
  0xd7   :  { %v251_v5 = vadd.f32 %v882_v3, %v216_v1  ;;  %v898_v1 = vld [vmem:[%s1935_s4 + $0x90] sm:$0xff] }
  0xd8   :  { %v1273_v3 = vpack.c.bf16 %v899_v2, %v898_v1 }
  0xd9   :  { %v286_v7 = vadd.f32 %v887_v4, %v251_v5  ;;  %v297_v9 = vpop.permute.xlu1 %296  ;;  %v553_v4 = vld [vmem:[%s1935_s4] sm:$0xff]  ;;  %v554_v5 = vld [vmem:[%s1935_s4 + $0x8] sm:$0xff] }
  0xda   :  { %vm306_vm9 = vcmp.eq.s32.totalorder %v297_v9, %v1643_v6  ;;  %1274 = vmatpush3.bf16.msra.mxu0 %v1273_v3  ;;  %v555_v9 = vld [vmem:[%s1935_s4 + $0x10] sm:$0xff]  ;;  %v912_v3 = vld [vmem:[%s1935_s4 + $0x100] sm:$0xff] }
  0xdb   :  { %v892_v10 = vsel %vm306_vm9, 1.0, %v1443_v36  ;;  %vm273_vm9 = vcmp.eq.s32.totalorder %v268_v55, %v1643_v6  ;;  %1275 = vmatprep.subr.bf16.mxu0 %v1436_v8  ;;  %v910_v55 = vld [vmem:[%s1935_s4 + $0xf0] sm:$0xff] }
  0xdc   :  { %v321_v11 = vadd.f32 %v892_v10, %v286_v7  ;;  %v889_v57 = vsel %vm273_vm9, 1.0, %v1443_v36  ;;  %v1294_v7 = vpack.c.bf16 %v554_v5, %v553_v4  ;;  %v556_v10 = vld [vmem:[%s1935_s4 + $0x18] sm:$0xff]  ;;  %v913_v4 = vld [vmem:[%s1935_s4 + $0x108] sm:$0xff] }
  0xdd   :  { %v1318_v5 = vpack.c.bf16 %v913_v4, %v912_v3 }
  0xde   :  { %v326_v12 = vmul.f32 0.125, %v321_v11  ;;  %v55_v13 = vpop.permute.xlu1 %54 }
  0xdf   :  { %vm62_vm10 = vcmp.eq.s32.totalorder %v55_v13, %v1643_v6  ;;  %v1297_v13 = vpack.c.bf16 %v556_v10, %v555_v9  ;;  %v915_v9 = vld [vmem:[%s1935_s4 + $0x118] sm:$0xff] }
  0xe0   :  { %1061 = vmatmul.mubr.f32.gmra.mrb[4].mxu0 %v326_v12  ;;  %v858_v18 = vsel %vm62_vm10, 1.0, %v1443_v36 }
  0xe1   :  { %1063 = vmatprep.mubr.msk.f32.mxu0 %vm1442_vm0, %v1443_v36  ;;  %v112_v21 = vadd.f32 %v863_v19, %v858_v18  ;;  %v560_v18 = vld [vmem:[%s1935_s4 + $0x38] sm:$0xff] }
  0xe3   :  { %v125_v14 = vpop.permute.xlu1 %124 }
  0xe4   :  { %vm132_vm12 = vcmp.eq.s32.totalorder %v125_v14, %v1643_v6  ;;  %v557_v14 = vld [vmem:[%s1935_s4 + $0x20] sm:$0xff] }
  0xe5   :  { %v868_v22 = vsel %vm132_vm12, 1.0, %v1443_v36 }
  0xe6   :  { %v147_v25 = vadd.f32 %v868_v22, %v112_v21  ;;  %v562_v21 = vld [vmem:[%s1935_s4 + $0x48] sm:$0xff] }
  0xe7   :  { %v1306_v24 = vpack.c.bf16 %v562_v21, %v561_v20 }
  0xe8   :  { %v58_v15 = vpop.permute.xlu1 %57 }
  0xe9   :  { %vm63_vm14 = vcmp.eq.s32.totalorder %v58_v15, %v1643_v6  ;;  %v558_v15 = vld [vmem:[%s1935_s4 + $0x28] sm:$0xff] }
  0xea   :  { %v859_v28 = vsel %vm63_vm14, 1.0, %v1443_v36  ;;  %v1300_v16 = vpack.c.bf16 %v558_v15, %v557_v14  ;;  %v918_v15 = vld [vmem:[%s1935_s4 + $0x130] sm:$0xff] }
  0xeb   :  { %v113_v33 = vadd.f32 %v864_v29, %v859_v28  ;;  %v901_v28 = vld [vmem:[%s1935_s4 + $0xa8] sm:$0xff]  ;;  %v563_v29 = vld [vmem:[%s1935_s4 + $0x50] sm:$0xff] }
  0xed   :  { %v160_v17 = vpop.permute.xlu1 %159  ;;  %v148_v39 = vadd.f32 %v869_v34, %v113_v33  ;;  %v902_v34 = vld [vmem:[%s1935_s4 + $0xb0] sm:$0xff] }
  0xee   :  { %vm167_vm13 = vcmp.eq.s32.totalorder %v160_v17, %v1643_v6  ;;  %v559_v17 = vld [vmem:[%s1935_s4 + $0x30] sm:$0xff] }
  0xef   :  { %v873_v26 = vsel %vm167_vm13, 1.0, %v1443_v36  ;;  %v1303_v19 = vpack.c.bf16 %v560_v18, %v559_v17  ;;  %v920_v17 = vld [vmem:[%s1935_s4 + $0x140] sm:$0xff]  ;;  %v921_v18 = vld [vmem:[%s1935_s4 + $0x148] sm:$0xff] }
  0xf0   :  { %v182_v30 = vadd.f32 %v873_v26, %v147_v25  ;;  %v1330_v21 = vpack.c.bf16 %v921_v18, %v920_v17 }
  0xf2   :  { %v195_v23 = vpop.permute.xlu1 %194 }
  0xf3   :  { %vm202_vm1 = vcmp.eq.s32.totalorder %v195_v23, %v1643_v6 }
  0xf4   :  { %v878_v31 = vsel %vm202_vm1, 1.0, %v1443_v36 }
  0xf5   :  { %v217_v37 = vadd.f32 %v878_v31, %v182_v30  ;;  %v564_v31 = vld [vmem:[%s1935_s4 + $0x58] sm:$0xff] }
  0xf6   :  { %v1309_v32 = vpack.c.bf16 %v564_v31, %v563_v29  ;;  %v926_v29 = vld [vmem:[%s1935_s4 + $0x170] sm:$0xff] }
  0xf7   :  { %v163_v27 = vpop.permute.xlu1 %162  ;;  %v252_v41 = vadd.f32 %v883_v38, %v217_v37  ;;  %v565_v37 = vld [vmem:[%s1935_s4 + $0x60] sm:$0xff] }
  0xf8   :  { %vm168_vm4 = vcmp.eq.s32.totalorder %v163_v27, %v1643_v6  ;;  %v900_v27 = vld [vmem:[%s1935_s4 + $0xa0] sm:$0xff] }
  0xf9   :  { %v874_v40 = vsel %vm168_vm4, 1.0, %v1443_v36  ;;  %v1276_v30 = vpack.c.bf16 %v901_v28, %v900_v27  ;;  %v925_v27 = vld [vmem:[%s1935_s4 + $0x168] sm:$0xff] }
  0xfa   :  { %v183_v43 = vadd.f32 %v874_v40, %v148_v39  ;;  %v566_v39 = vld [vmem:[%s1935_s4 + $0x68] sm:$0xff] }
  0xfb   :  { %1277 = vmatpush3.bf16.msra.mxu0 %v1276_v30  ;;  %v927_v30 = vld [vmem:[%s1935_s4 + $0x178] sm:$0xff] }
  0xfc   :  { %v198_v35 = vpop.permute.xlu1 %197  ;;  %1278 = vmatprep.subr.bf16.mxu0 %v1436_v8  ;;  %v1339_v31 = vpack.c.bf16 %v927_v30, %v926_v29 }
  0xfd   :  { %vm203_vm5 = vcmp.eq.s32.totalorder %v198_v35, %v1643_v6  ;;  %v903_v35 = vld [vmem:[%s1935_s4 + $0xb8] sm:$0xff] }
  0xfe   :  { %v879_v45 = vsel %vm203_vm5, 1.0, %v1443_v36  ;;  %v1279_v38 = vpack.c.bf16 %v903_v35, %v902_v34 }
  0xff   :  { %v218_v49 = vadd.f32 %v879_v45, %v183_v43  ;;  %v1312_v43 = vpack.c.bf16 %v566_v39, %v565_v37  ;;  %v568_v45 = vld [vmem:[%s1935_s4 + $0x78] sm:$0xff] }
 0x100   :  { %1280 = vmatpush3.bf16.msra.mxu0 %v1279_v38 }
 0x101   :  { %v265_v42 = vpop.permute.xlu1 %264  ;;  %v253_v53 = vadd.f32 %v884_v50, %v218_v49  ;;  %1281 = vmatprep.subr.bf16.mxu0 %v1436_v8  ;;  %v906_v50 = vld [vmem:[%s1935_s4 + $0xd0] sm:$0xff] }
 0x102   :  { %vm272_vm6 = vcmp.eq.s32.totalorder %v265_v42, %v1643_v6  ;;  %v905_v42 = vld [vmem:[%s1935_s4 + $0xc8] sm:$0xff] }
 0x103   :  { %v888_v44 = vsel %vm272_vm6, 1.0, %v1443_v36  ;;  %v288_v59 = vadd.f32 %v889_v57, %v253_v53  ;;  %v908_v53 = vld [vmem:[%s1935_s4 + $0xe0] sm:$0xff]  ;;  %v911_v57 = vld [vmem:[%s1935_s4 + $0xf8] sm:$0xff] }
 0x104   :  { %v287_v47 = vadd.f32 %v888_v44, %v252_v41  ;;  %v904_v41 = vld [vmem:[%s1935_s4 + $0xc0] sm:$0xff]  ;;  %v567_v44 = vld [vmem:[%s1935_s4 + $0x70] sm:$0xff] }
 0x105   :  { %v1282_v46 = vpack.c.bf16 %v905_v42, %v904_v41 }
 0x106   :  { %v300_v48 = vpop.permute.xlu1 %299 }
 0x107   :  { %vm307_vm8 = vcmp.eq.s32.totalorder %v300_v48, %v1643_v6  ;;  %1283 = vmatpush3.bf16.msra.mxu0 %v1282_v46 }
 0x108   :  { %v893_v51 = vsel %vm307_vm8, 1.0, %v1443_v36  ;;  %1284 = vmatprep.subr.bf16.mxu0 %v1436_v8 }
 0x109   :  { %v322_v52 = vadd.f32 %v893_v51, %v287_v47  ;;  %v1315_v47 = vpack.c.bf16 %v568_v45, %v567_v44  ;;  %v907_v51 = vld [vmem:[%s1935_s4 + $0xd8] sm:$0xff] }
 0x10a   :  { %v303_v56 = vpop.permute.xlu1 %302 }
 0x10b   :  { %v327_v54 = vmul.f32 0.125, %v322_v52  ;;  %vm308_vm10 = vcmp.eq.s32.totalorder %v303_v56, %v1643_v6  ;;  %v1285_v52 = vpack.c.bf16 %v907_v51, %v906_v50 }
 0x10c   :  { %v894_v58 = vsel %vm308_vm10, 1.0, %v1443_v36 }
 0x10d   :  { %1064 = vmatmul.mubr.f32.gmra.mrb[6].mxu0 %v327_v54  ;;  %v323_v60 = vadd.f32 %v894_v58, %v288_v59  ;;  %v909_v54 = vld [vmem:[%s1935_s4 + $0xe8] sm:$0xff]  ;;  %v1291_v58 = vpack.c.bf16 %v911_v57, %v910_v55  ;;  %v1859_v59 = vld [vmem:[%s1934_s3] ss:$0 sm:$0xff] }
 0x10e   :  { %1066 = vmatprep.mubr.msk.f32.mxu0 %vm1442_vm0, %v1443_v36  ;;  %1286 = vmatpush3.bf16.msra.mxu0 %v1285_v52  ;;  %v1288_v56 = vpack.c.bf16 %v909_v54, %v908_v53 }
 0x10f   :  { %v328_v61 = vmul.f32 0.125, %v323_v60  ;;  %1287 = vmatprep.subr.bf16.mxu0 %v1436_v8 }
 0x111   :  { %1067 = vmatmul.mubr.f32.gmra.mrb[8].mxu0 %v328_v61 }
 0x112   :  { %1148 = vmatprep.mubr.msk.f32.mxu0 %vm1442_vm0, %v1443_v36  ;;  %1289 = vmatpush3.bf16.msra.mxu0 %v1288_v56 }
 0x113   :  { %1290 = vmatprep.subr.bf16.mxu0 %v1436_v8 }
 0x116   :  { %1292 = vmatpush3.bf16.msra.mxu0 %v1291_v58 }
 0x117   :  { %1317 = vmatprep.subr.bf16.mxu0 %v1436_v8 }
 0x18d   :  { %v411_v11 = vpop.f32.mrb[0].mxu0 }
 0x18e   :  { %v1056_v12 = vpop.f32.mrb[1].mxu0  ;;  %1102 = vmatmul.mubr.f32.vlgmr.msra.gmra.mrb[0].mxu1 %v411_v11 }
 0x18f   :  { %1104 = vmatprep.mubr.msk.f32.mxu1 %vm1442_vm0, %v1443_v36  ;;  %1295 = vmatpush3.bf16.msra.mxu1 %v1294_v7  ;;  %v914_v7 = vld [vmem:[%s1935_s4 + $0x110] sm:$0xff]  ;;  %v916_v12 = vld [vmem:[%s1935_s4 + $0x120] sm:$0xff] }
 0x190   :  { %1296 = vmatprep.subr.bf16.mxu1 %v1436_v8  ;;  %v1321_v11 = vpack.c.bf16 %v915_v9, %v914_v7 }
 0x193   :  { %1298 = vmatpush3.bf16.msra.mxu1 %v1297_v13  ;;  %v917_v13 = vld [vmem:[%s1935_s4 + $0x128] sm:$0xff] }
 0x194   :  { %1299 = vmatprep.subr.bf16.mxu1 %v1436_v8  ;;  %v1324_v14 = vpack.c.bf16 %v917_v13, %v916_v12 }
 0x197   :  { %1301 = vmatpush3.bf16.msra.mxu1 %v1300_v16 }
 0x198   :  { %1302 = vmatprep.subr.bf16.mxu1 %v1436_v8 }
 0x19a   :  { %v416_v22 = vpop.f32.mrb[2].mxu0 }
 0x19b   :  { %v1059_v23 = vpop.f32.mrb[3].mxu0  ;;  %1105 = vmatmul.mubr.f32.gmra.mrb[2].mxu1 %v416_v22  ;;  %v922_v22 = vld [vmem:[%s1935_s4 + $0x150] sm:$0xff] }
 0x19c   :  { %1107 = vmatprep.mubr.msk.f32.mxu1 %vm1442_vm0, %v1443_v36  ;;  %1304 = vmatpush3.bf16.msra.mxu1 %v1303_v19  ;;  %v923_v23 = vld [vmem:[%s1935_s4 + $0x158] sm:$0xff] }
 0x19d   :  { %1305 = vmatprep.subr.bf16.mxu1 %v1436_v8 }
 0x1a0   :  { %1307 = vmatpush3.bf16.msra.mxu1 %v1306_v24 }
 0x1a1   :  { %1308 = vmatprep.subr.bf16.mxu1 %v1436_v8 }
 0x1a4   :  { %1310 = vmatpush3.bf16.msra.mxu1 %v1309_v32 }
 0x1a5   :  { %1311 = vmatprep.subr.bf16.mxu1 %v1436_v8 }
 0x1a8   :  { %1313 = vmatpush3.bf16.msra.mxu1 %v1312_v43 }
 0x1a9   :  { %1314 = vmatprep.subr.bf16.mxu1 %v1436_v8 }
 0x1ac   :  { %1316 = vmatpush3.bf16.msra.mxu1 %v1315_v47 }
 0x1b3   :  { %v421_v25 = vpop.f32.mrb[4].mxu0 }
 0x1b4   :  { %v1062_v26 = vpop.f32.mrb[5].mxu0  ;;  %1108 = vmatmul.mubr.f32.gmra.mrb[4].mxu1 %v421_v25  ;;  %v1333_v25 = vpack.c.bf16 %v923_v23, %v922_v22 }
 0x1b5   :  { %1110 = vmatprep.mubr.msk.f32.mxu1 %vm1442_vm0, %v1443_v36  ;;  %v924_v26 = vld [vmem:[%s1935_s4 + $0x160] sm:$0xff] }
 0x1b6   :  { %v1336_v28 = vpack.c.bf16 %v925_v27, %v924_v26 }
 0x1e0   :  { %v426_v33 = vpop.f32.mrb[6].mxu0 }
 0x1e1   :  { %v1065_v40 = vpop.f32.mrb[7].mxu0  ;;  %1111 = vmatmul.mubr.f32.gmra.mrb[6].mxu1 %v426_v33 }
 0x1e2   :  { %1113 = vmatprep.mubr.msk.f32.mxu1 %vm1442_vm0, %v1443_v36 }
 0x1e4   :  { %v431_v48 = vpop.f32.mrb[8].mxu0 }
 0x1e5   :  { %1114 = vmatmul.mubr.f32.gmra.mrb[8].mxu1 %v431_v48  ;;  %v1068_v49 = vpop.f32.mrb[9].mxu0 }
 0x1e6   :  { %1183 = vmatprep.mubr.msk.f32.mxu1 %vm1442_vm0, %v1443_v36  ;;  %v928_v49 = vld [vmem:[%s1936_s5] ss:$0 sm:$0xff] }
 0x261   :  { %v524_v60 = vpop.f32.mrb[0].mxu1 }
 0x262   :  { %v525_v61 = vadd.f32 %v1859_v59, %v524_v60  ;;  %v1103_v62 = vpop.f32.mrb[1].mxu1 }
 0x264   :  { %1392 = vtanh.f32 %v525_v61 }
 0x26e   :  { %v1393_v63 = vpop.eup %1392  ;;  %v529_v0 = vpop.f32.mrb[2].mxu1 }
 0x26f   :  { %v530_v1 = vadd.f32 %v1859_v59, %v529_v0  ;;  %v1106_v2 = vpop.f32.mrb[3].mxu1  ;;  %1184 = vmatmul.mubr.f32.vlgmr.msra.gmra.mrb[10].mxu1 %v1393_v63 }
 0x271   :  { %1394 = vtanh.f32 %v530_v1 }
 0x27b   :  { %v1395_v10 = vpop.eup %1394 }
 0x27c   :  { %1149 = vmatmul.mubr.f32.vlgmr.msra.gmra.mrb[10].mxu0 %v1395_v10 }
 0x27d   :  { %1319 = vmatpush3.bf16.msra.mxu0 %v1318_v5  ;;  %1218 = vmatprep.mubr.msk.f32.mxu0 %vm1442_vm0, %v1443_v36  ;;  %v919_v36 = vld [vmem:[%s1935_s4 + $0x138] sm:$0xff]  ;;  %vm846_vm0 = vcmp.eq.s32.totalorder %v1643_v6, 1 }
 0x27e   :  { %1320 = vmatprep.subr.bf16.mxu0 %v1436_v8  ;;  %v1327_v16 = vpack.c.bf16 %v919_v36, %v918_v15 }
 0x281   :  { %1322 = vmatpush3.bf16.msra.mxu0 %v1321_v11 }
 0x282   :  { %1323 = vmatprep.subr.bf16.mxu0 %v1436_v8 }
 0x285   :  { %1325 = vmatpush3.bf16.msra.mxu0 %v1324_v14 }
 0x286   :  { %1326 = vmatprep.subr.bf16.mxu0 %v1436_v8 }
 0x287   :  { %v534_v19 = vpop.f32.mrb[4].mxu1 }
 0x288   :  { %v1109_v20 = vpop.f32.mrb[5].mxu1  ;;  %v535_v24 = vadd.f32 %v1859_v59, %v534_v19 }
 0x289   :  { %1328 = vmatpush3.bf16.msra.mxu0 %v1327_v16 }
 0x28a   :  { %1329 = vmatprep.subr.bf16.mxu0 %v1436_v8  ;;  %1396 = vtanh.f32 %v535_v24 }
 0x28d   :  { %1331 = vmatpush3.bf16.msra.mxu0 %v1330_v21 }
 0x28e   :  { %1332 = vmatprep.subr.bf16.mxu0 %v1436_v8 }
 0x291   :  { %1334 = vmatpush3.bf16.msra.mxu0 %v1333_v25 }
 0x292   :  { %1335 = vmatprep.subr.bf16.mxu0 %v1436_v8 }
 0x294   :  { %v1397_v32 = vpop.eup %1396 }
 0x295   :  { %1337 = vmatpush3.bf16.msra.mxu0 %v1336_v28 }
 0x296   :  { %1338 = vmatprep.subr.bf16.mxu0 %v1436_v8 }
 0x299   :  { %1340 = vmatpush3.bf16.msra.mxu0 %v1339_v31 }
 0x29c   :  { %1219 = vmatmul.mubr.f32.vlgmr.msra.gmra.mrb[12].mxu0 %v1397_v32 }
 0x2b4   :  { %v539_v33 = vpop.f32.mrb[6].mxu1 }
 0x2b5   :  { %v1112_v34 = vpop.f32.mrb[7].mxu1  ;;  %v540_v37 = vadd.f32 %v1859_v59, %v539_v33 }
 0x2b8   :  { %v544_v35 = vpop.f32.mrb[8].mxu1 }
 0x2b9   :  { %v545_v38 = vadd.f32 %v1859_v59, %v544_v35  ;;  %v1115_v39 = vpop.f32.mrb[9].mxu1 }
 0x2bb   :  { %1398 = vtanh.f32 %v545_v38 }
 0x2bc   :  { %1400 = vtanh.f32 %v540_v37 }
 0x2c5   :  { %v1399_v40 = vpop.eup %1398 }
 0x2c6   :  { %v828_v41 = vmul.f32 %v1399_v40, %v1399_v40  ;;  %v1401_v42 = vpop.eup %1400 }
 0x2c7   :  { %v825_v43 = vmul.f32 %v1401_v42, %v1401_v42 }
 0x2c8   :  { %829 = vadd.xlane.f32.xlu0 %v828_v41 }
 0x2cc   :  { %826 = vadd.xlane.f32.xlu0 %v825_v43 }
 0x342   :  { %v722_v8 = vpop.f32.mrb[10].mxu1 }
 0x343   :  { %v1185_v44 = vpop.f32.mrb[11].mxu1 }
 0x34f   :  { %v652_v45 = vpop.f32.mrb[10].mxu0 }
 0x350   :  { %v723_v46 = vadd.f32 %v722_v8, %v652_v45  ;;  %v1150_v47 = vpop.f32.mrb[11].mxu0 }
 0x355   :  { %v830_v56 = vpop.xlane.xlu0 %829 }
 0x359   :  { %v827_v57 = vpop.xlane.xlu0 %826 }
 0x36f   :  { %v809_v48 = vpop.f32.mrb[12].mxu0 }
 0x370   :  { %v813_v50 = vadd.f32 %v809_v48, %v723_v46  ;;  %v1220_v51 = vpop.f32.mrb[13].mxu0 }
 0x372   :  { %v821_v52 = vadd.f32 %v928_v49, %v813_v50 }
 0x374   :  { %v831_v53 = vmul.f32 %v1401_v42, %v821_v52  ;;  %v822_v54 = vmul.f32 %v821_v52, %v821_v52  ;;  %v838_v55 = vmul.f32 %v1399_v40, %v821_v52 }
 0x376   :  { %832 = vadd.xlane.f32.xlu0 %v831_v53  ;;  %823 = vadd.xlane.f32.xlu1 %v822_v54 }
 0x37a   :  { %839 = vadd.xlane.f32.xlu1 %v838_v55 }
 0x403   :  { %v824_v58 = vpop.xlane.xlu1 %823  ;;  %v833_v0 = vpop.xlane.xlu0 %832 }
 0x404   :  { %v834_v59 = vmul.f32 %v827_v57, %v824_v58  ;;  %v841_v60 = vmul.f32 %v830_v56, %v824_v58 }
 0x406   :  { %v835_v61 = vmax.f32 %v834_v59, 1e-12  ;;  %v842_v62 = vmax.f32 %v841_v60, 1e-12 }
 0x407   :  { %v840_v3 = vpop.xlane.xlu1 %839 }
 0x408   :  { %1402 = vrsqrt.f32 %v835_v61 }
 0x409   :  { %1404 = vrsqrt.f32 %v842_v62 }
 0x412   :  { %v1403_v63 = vpop.eup %1402 }
 0x413   :  { %v1405_v1 = vpop.eup %1404  ;;  %v837_v2 = vmul.f32 %v1403_v63, %v833_v0 }
 0x414   :  { %v844_v4 = vmul.f32 %v1405_v1, %v840_v3 }
 0x416   :  { %v847_v5 = vsel %vm846_vm0, %v844_v4, 0.0 }
 0x417   :  { %v848_v7 = vsel %vm845_vm11, %v837_v2, %v847_v5 }
 0x418   :  { %849 = vst [vmem:[%s1937_s6] sm:$0xff] %v848_v7 }
 0x419   :  { %854 = vsyncpa [#allocation3], 1 }

</bundles_post_ra>
